<compile_context>
chip_gen: v7x
topology: tpu7x:2x2x1
jax: 0.10.0
libtpu: 0.0.40
codegen_flags: <defaults>
</compile_context>

<pallas_src>
import functools

import jax
import jax.numpy as jnp
import numpy as np
from jax import lax
from jax.experimental import pallas as pl
from jax.experimental.pallas import tpu as pltpu


def _round_up(v, m):
    return -(-v // m) * m


def _layout_dims(input_size, hidden_size):
    """Sublane-aligned widths of the per-tap x-block and h-block."""
    sx = _round_up(max(input_size, hidden_size), 8)
    sh = _round_up(hidden_size, 8)
    return sx, sh


# ----------------------------------------------------------------------------
# pltpu.roll direction probe (tiny one-shot kernel, run eagerly before tracing)
# ----------------------------------------------------------------------------
def detect_roll_sign():
    """Returns s such that pltpu.roll(v, (s*k) % N, ax) == jnp.roll(v, k, ax).

    Kept as a runtime probe (on the same default TPU backend as the main
    kernel) rather than a hard-coded convention so a compiler-side direction
    change cannot silently corrupt results; it raises if neither direction
    matches.
    """
    def probe(x_ref, o_ref):
        o_ref[...] = pltpu.roll(x_ref[...], 1, 1)

    x = jnp.broadcast_to(lax.iota(jnp.float32, 128), (8, 128))
    y = np.asarray(jax.device_get(pl.pallas_call(
        probe, out_shape=jax.ShapeDtypeStruct((8, 128), jnp.float32))(x)))
    base = np.broadcast_to(np.arange(128, dtype=np.float32), (8, 128))
    if np.array_equal(y, np.roll(base, 1, axis=1)):
        return 1
    if np.array_equal(y, np.roll(base, -1, axis=1)):
        return -1
    raise ValueError("Unexpected pltpu.roll semantics")


def _pick_batch_blocks(batch):
    """Leading ('parallel') grid-axis extent.

    v5e/v6e have a single TensorCore, so the whole batch is folded onto the
    lane axis (1 block -> fewest grid steps).  v7x has 2 TensorCores: keep a
    parallel axis that is a multiple of the core count so megacore sharding
    applies.  Falls back to 1 on any uncertainty (always correct).
    """
    ncores = 1
    try:
        info = pltpu.get_tpu_info()
        for name in ("num_cores", "num_tensorcores", "tensorcores_per_chip",
                     "core_count"):
            v = getattr(info, name, None)
            if isinstance(v, int) and v > 0:
                ncores = v
                break
    except Exception:
        ncores = 1
    if ncores > 1 and batch % ncores == 0:
        return ncores
    return 1


# ----------------------------------------------------------------------------
# Pallas kernel: whole ConvGRU stack, one time step per grid step
# ----------------------------------------------------------------------------
def _convgru_step_kernel(masks_ref, x_ref, w1_ref, w2_ref, y_ref, last_ref,
                         h_scr, p1_scr, p2_scr,
                         *, Ch, K, W, SX, SH, num_layers, roll_sign):
    KK = K * K
    P = K // 2
    S = SX + SH                       # per-tap rows in the (x, h) patch
    ones_row = KK * S                 # bias row (first of the trailing 8)
    N = x_ref.shape[-1]               # B_blk * H * W lanes
    t = pl.program_id(1)

    @pl.when(t == 0)
    def _init():
        # Fresh recurrent state for this batch block.  Zero the patch
        # scratches once so never-rewritten channel-padding rows stay exactly
        # 0 across all later grid steps, and write the constant ones row used
        # to fold the gate biases into the first matmul.
        h_scr[...] = jnp.zeros_like(h_scr)
        p1_scr[...] = jnp.zeros_like(p1_scr)
        p2_scr[...] = jnp.zeros_like(p2_scr)
        p1_scr[ones_row:ones_row + 1, :] = jnp.ones((1, N), jnp.float32)

    # Static per-tap lane-roll amounts over the flattened [B_blk*H*W] axis.
    # The precomputed per-image boundary masks (constant [K*K, N] input) both
    # implement the conv's "same" zero padding and kill any cross-image reads
    # caused by the roll wrapping across image boundaries.
    amounts = []
    for dy in range(K):
        for dx in range(K):
            off = (dy - P) * W + (dx - P)
            amounts.append((roll_sign * (-off)) % N)

    def shifted(v, i):
        amt = amounts[i]
        r = v if amt == 0 else pltpu.roll(v, amt, 1)
        return r * masks_ref[i:i + 1, :]

    inp = x_ref[...].astype(jnp.float32)       # [SX, N]; channels pre-padded
    for l in range(num_layers):
        h = h_scr[l]                           # [Ch, N]
        nx = inp.shape[0]
        # im2col of the combined (inp, h) input -> [KK*S (+8 bias rows), N].
        # All writes start on 8-sublane boundaries (SX, SH multiples of 8).
        for i in range(KK):
            base = i * S
            p1_scr[base:base + nx, :] = shifted(inp, i)
            p1_scr[base + SX:base + SX + Ch, :] = shifted(h, i)
        # Single fused MXU matmul: reset / update / x-part of out gate; the
        # gate biases ride the ones row of the patch scratch.
        acc = jnp.dot(w1_ref[l], p1_scr[...],
                      preferred_element_type=jnp.float32)        # [3*Ch, N]
        reset = jax.nn.sigmoid(acc[0:Ch, :])
        update = jax.nn.sigmoid(acc[Ch:2 * Ch, :])
        out_x = acc[2 * Ch:3 * Ch, :]
        # im2col of h*reset -> second MXU matmul for the out gate's h-part.
        hr = h * reset
        for i in range(KK):
            p2_scr[i * SH:i * SH + Ch, :] = shifted(hr, i)
        out = jnp.tanh(out_x + jnp.dot(w2_ref[l], p2_scr[...],
                                       preferred_element_type=jnp.float32))
        h_new = h * (1.0 - update) + out * update
        h_scr[l, :, :] = h_new                 # state stays resident in VMEM
        # TODO(synk): nn.Dropout(p=0.1) is stochastic in train mode; eval-mode
        # identity here.
        inp = h_new                            # feeds the next layer

    y_ref[...] = inp.astype(y_ref.dtype)       # final layer's h at time t

    @pl.when(t == pl.num_programs(1) - 1)
    def _emit_last():
        for l in range(num_layers):
            last_ref[l, :, :] = h_scr[l].astype(last_ref.dtype)


def _convgru_pallas(x_seq, masks, w1_all, w2_all, *, Ch, K, W, SX, SH,
                    num_layers, roll_sign):
    """x_seq: [NB, T, SX, N] -> (y_seq [NB,T,Ch,N], last [NB,L,Ch,N])."""
    NB, T, _, N = x_seq.shape
    L = num_layers
    KK = K * K
    COLS1 = w1_all.shape[-1]          # KK*(SX+SH) + 8 (bias columns)
    COLS2 = w2_all.shape[-1]          # KK*SH

    kernel = functools.partial(
        _convgru_step_kernel, Ch=Ch, K=K, W=W, SX=SX, SH=SH,
        num_layers=num_layers, roll_sign=roll_sign)

    # VMEM footprint (f32): p1 = COLS1*N*4, p2 = COLS2*N*4, h = L*Ch*N*4 plus
    # the resident weights/masks and double-buffered x/y blocks -- well under
    # 1 MiB at these sizes, so no vmem_limit_bytes override is needed even on
    # v7x's 64 MiB (32 MiB scoped) budget.
    return pl.pallas_call(
        kernel,
        out_shape=(
            jax.ShapeDtypeStruct((NB, T, Ch, N), x_seq.dtype),   # final layer
            jax.ShapeDtypeStruct((NB, L, Ch, N), x_seq.dtype),   # last states
        ),
        grid=(NB, T),
        in_specs=[
            # Constant index_maps -> DMA'd once, resident in VMEM.
            pl.BlockSpec((KK, N), lambda b, t: (0, 0)),              # masks
            pl.BlockSpec((None, None, SX, N), lambda b, t: (b, t, 0, 0)),  # x[t]
            pl.BlockSpec((L, 3 * Ch, COLS1), lambda b, t: (0, 0, 0)),  # w1
            pl.BlockSpec((L, Ch, COLS2), lambda b, t: (0, 0, 0)),      # w2
        ],
        out_specs=(
            pl.BlockSpec((None, None, Ch, N), lambda b, t: (b, t, 0, 0)),
            # Constant over t -> stays resident; written only at t == T-1.
            pl.BlockSpec((None, L, Ch, N), lambda b, t: (b, 0, 0, 0)),
        ),
        scratch_shapes=[
            pltpu.VMEM((L, Ch, N), jnp.float32),      # per-layer hidden state
            pltpu.VMEM((COLS1, N), jnp.float32),      # im2col of (x, h) + bias row
            pltpu.VMEM((COLS2, N), jnp.float32),      # im2col of h*reset
        ],
        compiler_params=pltpu.CompilerParams(
            # Time MUST stay innermost and sequential ("arbitrary") for the
            # recurrence; the batch-block axis is parallel (megacore on v7x).
            dimension_semantics=("parallel", "arbitrary")),
    )(masks, x_seq, w1_all, w2_all)


# ----------------------------------------------------------------------------
# ConvGRUModel forward (layout glue in plain JAX, recurrence in Pallas)
# ----------------------------------------------------------------------------
def convgru_forward(x, w1_all, w2_all, *, input_size, hidden_size, kernel_size,
                    num_layers, roll_sign, batch_blocks=1):
    T, B, Cin, H, W = x.shape
    assert Cin == input_size
    Ch = hidden_size
    K = kernel_size
    P = K // 2
    HW = H * W
    if batch_blocks < 1 or B % batch_blocks != 0:
        batch_blocks = 1
    NB = batch_blocks
    Bblk = B // NB
    N = Bblk * HW
    SX, SH = _layout_dims(input_size, hidden_size)

    # Per-image "same"-padding masks for every conv tap, tiled across the
    # batch tile on the lane axis.  Constant, hoisted out of the kernel.
    pos = jnp.arange(HW)
    row, col = pos // W, pos % W
    mrows = []
    for dy in range(K):
        for dx in range(K):
            oy, ox = dy - P, dx - P
            mrows.append((row + oy >= 0) & (row + oy < H) &
                         (col + ox >= 0) & (col + ox < W))
    masks = jnp.tile(jnp.stack(mrows).astype(jnp.float32), (1, Bblk))  # [KK, N]

    # Repack x: [T,B,Cin,H,W] -> [NB, T, SX, Bblk*HW].  The batch tile rides
    # the lane axis next to HW; channels (zero-padded to SX) ride sublanes.
    xb = jnp.transpose(x, (1, 0, 2, 3, 4)).reshape(NB, Bblk, T, Cin, HW)
    if SX > Cin:
        xb = jnp.pad(xb, ((0, 0), (0, 0), (0, 0), (0, SX - Cin), (0, 0)))
    xb = jnp.transpose(xb, (0, 2, 3, 1, 4)).reshape(NB, T, SX, N)

    y_seq, last = _convgru_pallas(
        xb, masks, w1_all, w2_all, Ch=Ch, K=K, W=W, SX=SX, SH=SH,
        num_layers=num_layers, roll_sign=roll_sign)

    layer_output = jnp.transpose(
        y_seq.reshape(NB, T, Ch, Bblk, HW),
        (1, 0, 3, 2, 4)).reshape(T, B, Ch, H, W)
    last_state_list = jnp.transpose(
        last.reshape(NB, num_layers, Ch, Bblk, HW),
        (0, 3, 1, 2, 4)).reshape(B, num_layers, Ch, H, W)
    return layer_output, last_state_list


# ----------------------------------------------------------------------------
# Parameter init (mirrors nn.init.orthogonal_ on OIHW conv weights) + packing
# ----------------------------------------------------------------------------
def orthogonal_conv_weight(key, out_ch, in_ch, k):
    rows, cols = out_ch, in_ch * k * k
    a = jax.random.normal(key, (max(rows, cols), min(rows, cols)), jnp.float32)
    q, r = jnp.linalg.qr(a)
    q = q * jnp.where(jnp.diag(r) >= 0, 1.0, -1.0)
    if rows < cols:
        q = q.T
    return q[:rows, :cols].reshape(out_ch, in_ch, k, k)  # OIHW


def init_torch_params(key, input_size, hidden_size, kernel_size, num_layers):
    params = []
    for idx in range(num_layers):
        cin = input_size if idx == 0 else hidden_size
        ctot = cin + hidden_size
        key, k1, k2, k3 = jax.random.split(key, 4)
        wr = orthogonal_conv_weight(k1, hidden_size, ctot, kernel_size)
        wu = orthogonal_conv_weight(k2, hidden_size, ctot, kernel_size)
        wo = orthogonal_conv_weight(k3, hidden_size, ctot, kernel_size)
        br = jnp.zeros((hidden_size,), jnp.float32)
        bu = jnp.zeros((hidden_size,), jnp.float32)
        bo = jnp.zeros((hidden_size,), jnp.float32)
        params.append((wr, wu, wo, br, bu, bo))
    return params


def pack_params(torch_params, input_size, hidden_size, kernel_size):
    """OIHW gate weights -> fused, flattened, sublane-aligned matrices.

    w1[l]: [3*Ch, K*K*(SX+SH) + 8]  rows = [reset; update; out(x-part)],
           column layout per tap = [x-block (SX wide) | h-block (SH wide)],
           trailing 8 columns carry the biases (first column) for the ones row.
    w2[l]: [Ch, K*K*SH]             out gate's (h*reset) part.
    """
    Ch = hidden_size
    K = kernel_size
    KK = K * K
    SX, SH = _layout_dims(input_size, hidden_size)
    S = SX + SH
    w1_list, w2_list = [], []
    for idx, (wr, wu, wo, br, bu, bo) in enumerate(torch_params):
        Cx = input_size if idx == 0 else hidden_size

        def gate_cols(w, use_h=True):
            cols = jnp.zeros((Ch, KK, S), jnp.float32)
            wx = jnp.transpose(w[:, :Cx], (0, 2, 3, 1)).reshape(Ch, KK, Cx)
            cols = cols.at[:, :, 0:Cx].set(wx)
            if use_h:
                wh = jnp.transpose(w[:, Cx:], (0, 2, 3, 1)).reshape(Ch, KK, Ch)
                cols = cols.at[:, :, SX:SX + Ch].set(wh)
            return cols.reshape(Ch, KK * S)

        w1 = jnp.concatenate(
            [gate_cols(wr), gate_cols(wu), gate_cols(wo, use_h=False)], axis=0)
        bias_cols = jnp.zeros((3 * Ch, 8), jnp.float32)
        bias_cols = bias_cols.at[:, 0].set(jnp.concatenate([br, bu, bo]))
        w1 = jnp.concatenate([w1, bias_cols], axis=1)       # [3Ch, KK*S + 8]

        w2 = jnp.zeros((Ch, KK, SH), jnp.float32)
        woh = jnp.transpose(wo[:, Cx:], (0, 2, 3, 1)).reshape(Ch, KK, Ch)
        w2 = w2.at[:, :, 0:Ch].set(woh).reshape(Ch, KK * SH)

        w1_list.append(w1)
        w2_list.append(w2)
    return jnp.stack(w1_list), jnp.stack(w2_list)


# ----------------------------------------------------------------------------
# Pure-JAX reference (mirrors the PyTorch forward exactly, eval mode)
# ----------------------------------------------------------------------------
def _conv2d_nchw(x, w, b, pad):
    out = lax.conv_general_dilated(
        x, w, window_strides=(1, 1), padding=[(pad, pad), (pad, pad)],
        dimension_numbers=("NCHW", "OIHW", "NCHW"))
    return out + b[None, :, None, None]


def ref_forward(x, torch_params, *, hidden_size, kernel_size, num_layers):
    T, B, _, H, W = x.shape
    pad = kernel_size // 2
    cur = x
    last = []
    for idx in range(num_layers):
        wr, wu, wo, br, bu, bo = torch_params[idx]
        h = jnp.zeros((B, hidden_size, H, W), x.dtype)
        outs = []
        for t in range(T):
            combined = jnp.concatenate([cur[t], h], axis=1)
            update = jax.nn.sigmoid(_conv2d_nchw(combined, wu, bu, pad))
            reset = jax.nn.sigmoid(_conv2d_nchw(combined, wr, br, pad))
            combined2 = jnp.concatenate([cur[t], h * reset], axis=1)
            out = jnp.tanh(_conv2d_nchw(combined2, wo, bo, pad))
            h = h * (1.0 - update) + out * update
            outs.append(h)
        cur = jnp.stack(outs, axis=0)
        last.append(h)
    return cur, jnp.stack(last, axis=1)


# ----------------------------------------------------------------------------
if __name__ == "__main__":
    T, B = 8, 2
    input_size, hidden_size, kernel_size, num_layers = 4, 8, 3, 2
    H = W = 16

    roll_sign = detect_roll_sign()          # eager, tiny probe kernel
    batch_blocks = _pick_batch_blocks(B)    # 1 on v5e/v6e, core-count on v7x

    key = jax.random.PRNGKey(0)
    key, kx, kp = jax.random.split(key, 3)
    x = jax.random.normal(kx, (T, B, input_size, H, W), jnp.float32)
    torch_params = init_torch_params(
        kp, input_size, hidden_size, kernel_size, num_layers)
    w1_all, w2_all = pack_params(
        torch_params, input_size, hidden_size, kernel_size)

    fwd = jax.jit(functools.partial(
        convgru_forward, input_size=input_size, hidden_size=hidden_size,
        kernel_size=kernel_size, num_layers=num_layers, roll_sign=roll_sign,
        batch_blocks=batch_blocks))
    layer_output, last_state_list = fwd(x, w1_all, w2_all)
    jax.block_until_ready((layer_output, last_state_list))

    # Correctness check against the pure-JAX reference of the PyTorch forward.
    ref_out, ref_last = ref_forward(
        x, torch_params, hidden_size=hidden_size,
        kernel_size=kernel_size, num_layers=num_layers)
    assert layer_output.shape == (T, B, hidden_size, H, W)
    assert last_state_list.shape == (B, num_layers, hidden_size, H, W)
    np.testing.assert_allclose(np.asarray(layer_output), np.asarray(ref_out),
                               rtol=1e-4, atol=1e-4)
    np.testing.assert_allclose(np.asarray(last_state_list),
                               np.asarray(ref_last), rtol=1e-4, atol=1e-4)

    print("KERNEL_OK")
</pallas_src>

<mosaic_0001>
module attributes {stable_mosaic.version = 11 : i64} {
  func.func @probe(%arg0: memref<8x128xf32, #tpu.memory_space<vmem>>, %arg1: memref<8x128xf32, #tpu.memory_space<vmem>>) attributes {dimension_semantics = [], scalar_prefetch = 0 : i64, scratch_operands = 0 : i64, tpu.core_type = #tpu.core_type<tc>} {
    %c0 = arith.constant 0 : index
    %c0_0 = arith.constant 0 : index
    %0 = vector.load %arg0[%c0, %c0_0] : memref<8x128xf32, #tpu.memory_space<vmem>>, vector<8x128xf32>
    %c1_i32 = arith.constant 1 : i32
    %1 = tpu.dynamic_rotate %0 by %c1_i32 dim 1 : vector<8x128xf32>, i32 -> vector<8x128xf32>
    %c0_1 = arith.constant 0 : index
    %c0_2 = arith.constant 0 : index
    %2 = vector.load %arg1[%c0_1, %c0_2] : memref<8x128xf32, #tpu.memory_space<vmem>>, vector<8x128xf32>
    tpu.vector_store %arg1[%c0_1, %c0_2], %1 {strides = array<i32>} : memref<8x128xf32, #tpu.memory_space<vmem>>, vector<8x128xf32>,
    return
  }
}

</mosaic_0001>

<bundles_post_ra>
// kernel: tpu_custom_call.1
= control target key start
LH: loop header
LB: loop body
LE: loop exit
PB: predicated region body
PF: predicated region fallthrough
CT: control target
= control target key end

     0   :  { %6 = vsyncpa [#allocation3], 0  ;;  %s128_s0 = inlined_call_operand.hbm [shape: f32[8,128], index: 0, kind: input, shape index: {}]   ;;  %s129_s1 = inlined_call_operand.hbm [shape: f32[8,128], index: 1, kind: output, shape index: {}]  }
   0x1   :  { %7 = vsyncpa [#allocation4], 0  ;;  %s91_s6 = smov [#allocation2]   ;;  %s43_s10 = scalar_lea.hbm %s128_s0, 128 }
   0x2   :  { %s14_s7 = sshll.u32 %s91_s6, 4  ;;  %p44_p0 = scmp.ne.s32.totalorder %s128_s0, %s43_s10  ;;  %s15_s7 = int_to_ptr.vmem [resolvable:$true] %s14_s7 }
   0x3   :  { %p47_p1 = scmp.lt.u32.totalorder %s43_s10, %s128_s0 }
   0x5   :  { %p49_p2 = pnand %p47_p1, %p44_p0 }
   0x7   :  { %52 = shalt.err (!%p49_p2)
}
   0x8   :  { %s53_s15 = scalar_lea.vmem %s15_s7, 128  ;;  %p58_p4 = scmp.lt.s32.totalorder %s15_s7, %s15_s7 }
   0x9   :  { %p54_p3 = scmp.ne.s32.totalorder %s15_s7, %s53_s15  ;;  %p59_p5 = scmp.lt.s32.totalorder %s53_s15, %s53_s15 }
   0xb   :  { %p60_p6 = por %p59_p5, %p58_p4 }
   0xd   :  { %p61_p7 = pnand %p60_p6, %p54_p3 }
   0xf   :  { %64 = shalt.err (!%p61_p7)
}
  0x10   :  { %17 = dma.hbm_to_vmem [thread:$0]  %s128_s0, 128, %s15_s7, [#allocation3]  }
  0x11   :  { %87 = dma.done.wait [#allocation3], 128  }
  0x12   :  { %88 = vsyncadd [#allocation3], 4294967168  ;;  %v21_v0 = vld [vmem:[#allocation2] sm:$0xff]  ;;  %s92_s18 = smov 1   ;;  %s93_s19 = smov [#allocation5]  }
  0x13   :  { %22 = vrot.lane.b32.xlu0 %v21_v0, %s92_s18  ;;  %s31_s20 = sshll.u32 %s93_s19, 4  ;;  %s32_s20 = int_to_ptr.vmem [resolvable:$true] %s31_s20 }
  0x14   :  { %s65_s21 = scalar_lea.vmem %s32_s20, 128  ;;  %p70_p9 = scmp.lt.s32.totalorder %s32_s20, %s32_s20 }
  0x15   :  { %p66_p8 = scmp.ne.s32.totalorder %s32_s20, %s65_s21  ;;  %p71_p10 = scmp.lt.s32.totalorder %s65_s21, %s65_s21 }
  0x17   :  { %p72_p11 = por %p71_p10, %p70_p9 }
  0x19   :  { %p73_p12 = pnand %p72_p11, %p66_p8 }
  0x85   :  { %v23_v1 = vpop.permute.xlu0 %22 }
  0x86   :  { %24 = vst [vmem:[#allocation5] sm:$0xff] %v23_v1 }
  0x87   :  { %76 = shalt.err (!%p73_p12)
}
  0x88   :  { %s77_s0 = scalar_lea.hbm %s129_s1, 128 }
  0x89   :  { %p78_p13 = scmp.ne.s32.totalorder %s129_s1, %s77_s0  ;;  %p81_p0 = scmp.lt.u32.totalorder %s77_s0, %s129_s1 }
  0x8b   :  { %p83_p1 = pnand %p81_p0, %p78_p13 }
  0x8d   :  { %86 = shalt.err (!%p83_p1)
}
  0x8e   :  { %34 = dma.vmem_to_hbm [thread:$0]  %s32_s20, 128, %s129_s1, [#allocation4]  }
  0x8f   :  { %89 = dma.done.wait [#allocation4], 128  }
  0x90   :  { %90 = vsyncadd [#allocation4], 4294967168 }
  0x91   :  { %38 = vsyncpa [#allocation3], 1 }
  0x92   :  { %39 = vsyncpa [#allocation4], 1 }

</bundles_post_ra>
